<compile_context>
chip_gen: v7x
topology: tpu7x:2x2x1
jax: 0.10.0
libtpu: 0.0.40
codegen_flags: <defaults>
</compile_context>

<pallas_src>
import jax
import jax.numpy as jnp
from jax import lax
from jax.experimental import pallas as pl
from jax.experimental.pallas import tpu as pltpu


def _round_up(a, b):
    return (a + b - 1) // b * b


def _pick_tile_h(H):
    for cand in (512, 256, 128):
        if H > cand and H % cand == 0:
            return cand
    return H


# ---------------------------------------------------------------------------
# Router kernel: logits = tanh(x @ Wg1 + bg1) @ Wg2     (mlp_router=True path)
# Tiled over T; weights stay resident as full blocks.  Wg2 / logits are padded
# along the expert axis to a multiple of 128 for a lane-dense output store.
# ---------------------------------------------------------------------------
def router_kernel(x_ref, wg1_ref, bg1_ref, wg2_ref, logits_ref):
    h = jnp.dot(x_ref[...], wg1_ref[...], preferred_element_type=jnp.float32)
    h = jnp.tanh(h + bg1_ref[...].astype(jnp.float32))   # Dropout is a no-op in eval
    logits_ref[...] = jnp.dot(h.astype(wg2_ref.dtype), wg2_ref[...],
                              preferred_element_type=jnp.float32)


def router_logits(x, wg1, bg1, wg2, tile_t):
    T_pad, D = x.shape
    E = wg2.shape[1]
    E_pad = _round_up(E, 128)
    if E_pad != E:
        wg2 = jnp.pad(wg2, ((0, 0), (0, E_pad - E)))
    grid = (T_pad // tile_t,)
    logits = pl.pallas_call(
        router_kernel,
        out_shape=jax.ShapeDtypeStruct((T_pad, E_pad), jnp.float32),
        grid_spec=pltpu.PrefetchScalarGridSpec(
            num_scalar_prefetch=0,
            grid=grid,
            in_specs=[
                pl.BlockSpec((tile_t, D), lambda i: (i, 0)),
                pl.BlockSpec((D, D), lambda i: (0, 0)),
                pl.BlockSpec((1, D), lambda i: (0, 0)),
                pl.BlockSpec((D, E_pad), lambda i: (0, 0)),
            ],
            out_specs=pl.BlockSpec((tile_t, E_pad), lambda i: (i, 0)),
        ),
        compiler_params=pltpu.CompilerParams(
            dimension_semantics=("parallel",)),
    )(x, wg1, bg1, wg2)
    return logits[:, :E]


# ---------------------------------------------------------------------------
# Expert kernel:
#   y[t_tile] = sum_e sum_hc (relu(x @ W1[e][:, hc]) * g[:, e]) @ W2[e][hc, :]
# grid = (T_tiles, E, H_tiles); (E, H) are the reduction axes, accumulated
# into a VMEM f32 scratch.  A scalar-prefetched mask skips dead (tile, expert)
# pairs.
# ---------------------------------------------------------------------------
def moe_expert_kernel(mask_ref, x_ref, g_ref, w1_ref, w2_ref, o_ref, acc_ref):
    t = pl.program_id(0)
    e = pl.program_id(1)
    hi = pl.program_id(2)
    n_e = pl.num_programs(1)
    n_h = pl.num_programs(2)

    @pl.when(jnp.logical_and(e == 0, hi == 0))
    def _():
        acc_ref[...] = jnp.zeros_like(acc_ref)

    @pl.when(mask_ref[t * n_e + e] != 0)
    def _():
        x = x_ref[...]                                                 # (tT, D)
        h = jnp.dot(x, w1_ref[0], preferred_element_type=jnp.float32)  # (tT, tH) f32
        h = jnp.maximum(h, 0.0)                                        # ReLU (f32, VPU)
        g = g_ref[0].astype(jnp.float32)                               # (tT, 1)
        h = h * g                                                      # fold gate before 2nd matmul
        # bare accumulate of the MXU result (MRB in-place accumulate on v7x)
        acc_ref[...] += jnp.dot(h.astype(w2_ref.dtype), w2_ref[0],
                                preferred_element_type=jnp.float32)

    @pl.when(jnp.logical_and(e == n_e - 1, hi == n_h - 1))
    def _():
        o_ref[...] = acc_ref[...].astype(o_ref.dtype)


def moe_expert_apply(x, gates_et, w1, w2, mask, *, tile_t, tile_h, out_dtype):
    T_pad, D = x.shape
    E, _, H = w1.shape
    assert T_pad % tile_t == 0 and H % tile_h == 0
    grid = (T_pad // tile_t, E, H // tile_h)

    cbytes = jnp.dtype(x.dtype).itemsize
    obytes = jnp.dtype(out_dtype).itemsize
    # rough per-step VMEM estimate (double-buffered inputs/output + f32 acc)
    est = (2 * tile_t * D * cbytes
           + 2 * tile_t * 128 * 4                      # gate column (lane-padded)
           + 2 * 2 * D * tile_h * cbytes               # W1 + W2, double-buffered
           + 2 * tile_t * D * obytes
           + tile_t * D * 4)
    vmem_limit = int(min(max(2 * est, 32 * 1024 * 1024), 56 * 1024 * 1024))

    return pl.pallas_call(
        moe_expert_kernel,
        out_shape=jax.ShapeDtypeStruct((T_pad, D), out_dtype),
        grid_spec=pltpu.PrefetchScalarGridSpec(
            num_scalar_prefetch=1,
            grid=grid,
            in_specs=[
                pl.BlockSpec((tile_t, D), lambda t, e, h, m: (t, 0)),
                pl.BlockSpec((1, tile_t, 1), lambda t, e, h, m: (e, t, 0)),
                pl.BlockSpec((1, D, tile_h), lambda t, e, h, m: (e, 0, h)),
                pl.BlockSpec((1, tile_h, D), lambda t, e, h, m: (e, h, 0)),
            ],
            out_specs=pl.BlockSpec((tile_t, D), lambda t, e, h, m: (t, 0)),
            scratch_shapes=[pltpu.VMEM((tile_t, D), jnp.float32)],
        ),
        compiler_params=pltpu.CompilerParams(
            dimension_semantics=("parallel", "arbitrary", "arbitrary"),
            vmem_limit_bytes=vmem_limit),
    )(mask, x, gates_et, w1, w2)


# ---------------------------------------------------------------------------
# Full MoE forward (eval mode, noisy_gating=False, all aux-loss coefs = 0)
# ---------------------------------------------------------------------------
def moe_forward(x, params, k, *, tile_t=256, compute_dtype=jnp.bfloat16):
    bsz, length, D = x.shape
    T = bsz * length
    out_dtype = x.dtype
    x2 = x.reshape(T, D)

    E, _, H = params["w1"].shape

    # --- token tiling / tail padding (no silently dropped tokens) ---
    tile_t = min(tile_t, _round_up(T, 8))
    tile_t = max(8, tile_t - tile_t % 8)          # multiple of 8
    T_pad = _round_up(T, tile_t)
    x2p = jnp.pad(x2, ((0, T_pad - T), (0, 0))) if T_pad != T else x2

    # --- top_k_gating (router in Pallas, softmax/top-k/scatter in plain JAX) ---
    logits = router_logits(x2p, params["wg1"], params["bg1"], params["wg2"],
                           tile_t)[:T]
    probs = jax.nn.softmax(logits, axis=1)                       # (T, E)
    top_k_gates, top_k_indices = lax.top_k(probs, k)             # (T, k)
    top_k_gates = top_k_gates / (top_k_gates.sum(axis=1, keepdims=True) + 1e-6)

    gates = jnp.zeros((T, E), jnp.float32)
    gates = gates.at[jnp.arange(T)[:, None], top_k_indices].set(top_k_gates)

    # all loss coefficients are 0 by default -> loss = 0
    loss = jnp.float32(0.0)

    # pad gates along T; padded tokens have zero gates (and are sliced off)
    gates_pad = (jnp.pad(gates, ((0, T_pad - T), (0, 0)))
                 if T_pad != T else gates)

    # (T_tiles * E,) int32 expert-activity mask for skipping dead tiles
    T_tiles = T_pad // tile_t
    active = (gates_pad.reshape(T_tiles, tile_t, E) > 0).any(axis=1)
    mask = active.astype(jnp.int32).reshape(-1)

    # gate columns delivered via BlockSpec: (E, T_pad, 1)
    gates_et = jnp.transpose(gates_pad)[:, :, None].astype(jnp.float32)

    # --- expert compute + gate-weighted combine (Pallas hot path) ---
    tile_h = _pick_tile_h(H)
    y = moe_expert_apply(
        x2p.astype(compute_dtype),
        gates_et,
        params["w1"].astype(compute_dtype),
        params["w2"].astype(compute_dtype),
        mask,
        tile_t=tile_t, tile_h=tile_h, out_dtype=out_dtype)

    return y[:T].reshape(bsz, length, D), loss


# pure-JAX reference for a sanity check
def moe_reference(x, params, k):
    bsz, length, D = x.shape
    x2 = x.reshape(-1, D)
    h = jnp.tanh(x2 @ params["wg1"] + params["bg1"])
    logits = h @ params["wg2"]
    probs = jax.nn.softmax(logits, axis=1)
    tg, ti = lax.top_k(probs, k)
    tg = tg / (tg.sum(axis=1, keepdims=True) + 1e-6)
    E = probs.shape[1]
    gates = jnp.zeros_like(probs).at[jnp.arange(x2.shape[0])[:, None], ti].set(tg)
    y = jnp.zeros_like(x2)
    for e in range(E):
        he = jnp.maximum(x2 @ params["w1"][e], 0.0)
        y = y + gates[:, e:e + 1] * (he @ params["w2"][e])
    return y.reshape(bsz, length, D)


if __name__ == "__main__":
    # small shapes consistent with the module's forward
    bsz, length = 2, 10
    input_size, head_size, num_experts, k = 32, 32, 4, 2

    key = jax.random.PRNGKey(0)
    k0, k1, k2, k3, k4, k5 = jax.random.split(key, 6)

    params = {
        # MLP router: Linear(D, D) -> Tanh -> Linear(D, E, bias=False)
        "wg1": 0.1 * jax.random.normal(k0, (input_size, input_size), jnp.float32),
        "bg1": 0.1 * jax.random.normal(k1, (1, input_size), jnp.float32),
        "wg2": 0.1 * jax.random.normal(k2, (input_size, num_experts), jnp.float32),
        # ParallelExperts weights
        "w1": 0.1 * jax.random.normal(k3, (num_experts, input_size, head_size), jnp.float32),
        "w2": 0.1 * jax.random.normal(k4, (num_experts, head_size, input_size), jnp.float32),
    }

    x = jax.random.normal(k5, (bsz, length, input_size), jnp.float32)
    y_ref = moe_reference(x, params, k)

    # 1) f32 compute, small token tile: exercises multi-tile grid, tail padding
    #    and the expert-skip mask; tight tolerance.
    y32, loss = moe_forward(x, params, k, tile_t=8, compute_dtype=jnp.float32)
    y32 = jax.block_until_ready(y32)
    assert y32.shape == (bsz, length, input_size)
    assert jnp.allclose(y32, y_ref, atol=1e-4, rtol=1e-4), "f32 mismatch vs reference"

    # 2) default perf config: bf16 matmul operands, f32 accumulation.
    ybf, _ = moe_forward(x, params, k)          # tile_t=256 default (clamped to T_pad)
    ybf = jax.block_until_ready(ybf)
    assert jnp.allclose(ybf, y_ref, atol=2e-2, rtol=2e-2), "bf16 mismatch vs reference"

    print("KERNEL_OK")
</pallas_src>

<mosaic_0001>
module attributes {stable_mosaic.version = 11 : i64} {
  func.func @router_kernel(%arg0: i32, %arg1: memref<8x32xf32, #tpu.memory_space<vmem>>, %arg2: memref<32x32xf32, #tpu.memory_space<vmem>>, %arg3: memref<1x32xf32, #tpu.memory_space<vmem>>, %arg4: memref<32x128xf32, #tpu.memory_space<vmem>>, %arg5: memref<8x128xf32, #tpu.memory_space<vmem>>) attributes {dimension_semantics = [#tpu.dimension_semantics<parallel>], iteration_bounds = array<i64: 3>, scalar_prefetch = 0 : i64, scratch_operands = 0 : i64, tpu.core_type = #tpu.core_type<tc>, window_params = [{transform_indices = @transform_0, window_bounds = array<i64: 8, 32>}, {pipeline_mode = #tpu.pipeline_mode<synchronous>, transform_indices = @transform_1, window_bounds = array<i64: 32, 32>}, {pipeline_mode = #tpu.pipeline_mode<synchronous>, transform_indices = @transform_2, window_bounds = array<i64: 1, 32>}, {pipeline_mode = #tpu.pipeline_mode<synchronous>, transform_indices = @transform_3, window_bounds = array<i64: 32, 128>}, {transform_indices = @transform_4, window_bounds = array<i64: 8, 128>}]} {
    %c0 = arith.constant 0 : index
    %c0_0 = arith.constant 0 : index
    %0 = vector.load %arg1[%c0, %c0_0] : memref<8x32xf32, #tpu.memory_space<vmem>>, vector<8x32xf32>
    %c0_1 = arith.constant 0 : index
    %c0_2 = arith.constant 0 : index
    %1 = vector.load %arg2[%c0_1, %c0_2] : memref<32x32xf32, #tpu.memory_space<vmem>>, vector<32x32xf32>
    %cst = arith.constant dense<0.000000e+00> : vector<8x32xf32>
    %2 = tpu.matmul %0, %1, %cst {dimension_numbers = #tpu.dot_dimension_numbers<[1], [0], [0], [1], [0, 0, 1, 1], [], []>} : vector<8x32xf32>, vector<32x32xf32>, vector<8x32xf32> -> vector<8x32xf32>
    %c0_3 = arith.constant 0 : index
    %c0_4 = arith.constant 0 : index
    %3 = vector.load %arg3[%c0_3, %c0_4] : memref<1x32xf32, #tpu.memory_space<vmem>>, vector<1x32xf32>
    %4 = vector.broadcast %3 : vector<1x32xf32> to vector<8x32xf32>
    %5 = arith.addf %2, %4 : vector<8x32xf32>
    %6 = math.tanh %5 : vector<8x32xf32>
    %c0_5 = arith.constant 0 : index
    %c0_6 = arith.constant 0 : index
    %7 = vector.load %arg4[%c0_5, %c0_6] : memref<32x128xf32, #tpu.memory_space<vmem>>, vector<32x128xf32>
    %cst_7 = arith.constant dense<0.000000e+00> : vector<8x128xf32>
    %8 = tpu.matmul %6, %7, %cst_7 {dimension_numbers = #tpu.dot_dimension_numbers<[1], [0], [0], [1], [0, 0, 1, 1], [], []>} : vector<8x32xf32>, vector<32x128xf32>, vector<8x128xf32> -> vector<8x128xf32>
    %c0_8 = arith.constant 0 : index
    %c0_9 = arith.constant 0 : index
    %9 = vector.load %arg5[%c0_8, %c0_9] : memref<8x128xf32, #tpu.memory_space<vmem>>, vector<8x128xf32>
    tpu.vector_store %arg5[%c0_8, %c0_9], %8 {strides = array<i32>} : memref<8x128xf32, #tpu.memory_space<vmem>>, vector<8x128xf32>,
    return
  }
  func.func @transform_0(%arg0: i32) -> (i32, i32) {
    %c0_i32 = arith.constant 0 : i32
    %c0_i32_0 = arith.constant 0 : i32
    return %arg0, %c0_i32 : i32, i32
  }
  func.func @transform_1(%arg0: i32) -> (i32, i32) {
    %c0_i32 = arith.constant 0 : i32
    %c0_i32_0 = arith.constant 0 : i32
    %c0_i32_1 = arith.constant 0 : i32
    return %c0_i32, %c0_i32_0 : i32, i32
  }
  func.func @transform_2(%arg0: i32) -> (i32, i32) {
    %c0_i32 = arith.constant 0 : i32
    %c0_i32_0 = arith.constant 0 : i32
    %c0_i32_1 = arith.constant 0 : i32
    return %c0_i32, %c0_i32_0 : i32, i32
  }
  func.func @transform_3(%arg0: i32) -> (i32, i32) {
    %c0_i32 = arith.constant 0 : i32
    %c0_i32_0 = arith.constant 0 : i32
    %c0_i32_1 = arith.constant 0 : i32
    return %c0_i32, %c0_i32_0 : i32, i32
  }
  func.func @transform_4(%arg0: i32) -> (i32, i32) {
    %c0_i32 = arith.constant 0 : i32
    %c0_i32_0 = arith.constant 0 : i32
    return %arg0, %c0_i32 : i32, i32
  }
}

</mosaic_0001>

<bundles_post_ra>
// kernel: tpu_custom_call.1
= control target key start
LH: loop header
LB: loop body
LE: loop exit
PB: predicated region body
PF: predicated region fallthrough
CT: control target
= control target key end

     0   :  { %9 = vsyncpa [#allocation3], 0  ;;  %s1068_s0 = inlined_call_operand.hbm [shape: f32[24,32], index: 0, kind: input, shape index: {}]   ;;  %s1069_s1 = inlined_call_operand.hbm [shape: f32[32,32], index: 1, kind: input, shape index: {}]   ;;  %s1070_s2 = inlined_call_operand.vmem [shape: f32[1,32], index: 2, kind: input, shape index: {}]   ;;  %s1071_s3 = inlined_call_operand.hbm [shape: f32[32,128], index: 3, kind: input, shape index: {}]   ;;  %s1072_s4 = inlined_call_operand.hbm [shape: f32[24,128], index: 4, kind: output, shape index: {}]  }
   0x1   :  { %11 = vsyncpa [#allocation3 + $0x1], 0 }
   0x2   :  { %12 = vsyncpa [#allocation6], 0 }
   0x3   :  { %13 = vsyncpa [#allocation4], 0 }
   0x4   :  { %15 = vsyncpa [#allocation4 + $0x1], 0  ;;  %s839_s15 = smov 0   ;;  %s841_s16 = smov 0  }
   0x5   :  { %s843_s17 = smov 0   ;;  %s845_s18 = smov 0  }
   0x6 LB: > { %s860_s19 = sadd.s32 4294967295, %s803_s18   ;;  %s510_s20 = sadd.s32 4294967294, %s803_s18   ;;  %s803_s18 = sphi %s845_s18, %s1091_s18   ;;  %s799_s17 = sphi %s843_s17, %s1090_s17   ;;  %s795_s16 = sphi %s841_s16, %s1089_s16   ;;  %s791_s15 = sphi %s839_s15, %s1088_s15  }
   0x7   : > { %p41_p0 = scmp.ne.s32.totalorder %s795_s16, %s791_s15  ;;  %p1073_p1 = scmp.eq.s32.totalorder %s860_s19, 0 }
   0x8   : > { %p134_p3 = scmp.eq.s32.totalorder %s510_s20, 2  ;;  %p511_p5 = scmp.ge.s32.totalorder %s803_s18, 1 }
   0x9   : > { %p869_p4 = por %p1073_p1, %p41_p0  ;;  %p141_p7 = scmp.lt.s32.totalorder %s803_s18, 4 }
   0xa   : > { %p874_p6 = por %p134_p3, %p41_p0  ;;  %s805_s24 = smov [#allocation5]  }
   0xb   : > { %s1076_s21 = scalar_select %p869_p4, 1, 0 }
   0xc   : > { %s1077_s22 = scalar_select %p874_p6, 1, 0 }
   0xd   : > { %p879_p8 = pnand %p511_p5, %p141_p7  ;;  %s153_s25 = sshll.u32 %s805_s24, 4  ;;  %s154_s25 = int_to_ptr.vmem [resolvable:$true] %s153_s25 }
   0xe   : > { %s806_s27 = smov [#allocation7]   ;;  %s647_s5 = scalar_lea.hbm %s1069_s1, 512 }
   0xf   : > { %s1078_s23 = scalar_select %p879_p8, 1, 0 }
  0x10   : > { %p585_p9 = pneg %p879_p8  ;;  %s169_s28 = sshll.u32 %s806_s27, 4  ;;  %s891_s28 = int_to_ptr.vmem [resolvable:$true] %s169_s28 }
  0x11   : > { %p648_p11 = scmp.ne.s32.totalorder %s1069_s1, %s647_s5  ;;  %p654_p3 = scmp.lt.u32.totalorder %s647_s5, %s1069_s1 }
  0x12   : > { %p887_p10 = pnand %p585_p9, %p1073_p1 }
  0x14   : > { %p649_p12 = pneg %p887_p10 }
  0x16   : > { %p650_p13 = pnand %p649_p12, %p648_p11 }
  0x18   : > { %p651_p0 = pneg %p650_p13 }
  0x1a   : > { %p656_p5 = pnand %p654_p3, %p651_p0 }
  0x1c   : > { %659 = shalt.err (!%p656_p5)
}
  0x1d   : > { %s660_s10 = scalar_lea.vmem %s154_s25, 512  ;;  %p668_p2 = scmp.lt.s32.totalorder %s154_s25, %s154_s25 }
  0x1e   : > { %p661_p7 = scmp.ne.s32.totalorder %s154_s25, %s660_s10  ;;  %p669_p6 = scmp.lt.s32.totalorder %s660_s10, %s660_s10 }
  0x20   : > { %p663_p9 = pnand %p661_p7, %p649_p12  ;;  %p670_p4 = por %p669_p6, %p668_p2 }
  0x22   : > { %p664_p1 = pneg %p663_p9 }
  0x24   : > { %p671_p8 = pnand %p670_p4, %p664_p1 }
  0x26   : > { %674 = shalt.err (!%p671_p8)
}
  0x27   : > { %s807_s11 = smov 128   ;;  %s808_s12 = smov 8  }
  0x28   : > { %588 = dma.hbm_to_vmem [thread:$0]  (!%p887_p10), %s1069_s1, 512, %s154_s25, [#allocation6], %s807_s11, %s807_s11, %s808_s12  }
  0x29   : > { %s675_s27 = scalar_lea.hbm %s1071_s3, 512 }
  0x2a   : > { %p676_p11 = scmp.ne.s32.totalorder %s1071_s3, %s675_s27  ;;  %p682_p4 = scmp.lt.u32.totalorder %s675_s27, %s1071_s3 }
  0x2c   : > { %p678_p1 = pnand %p676_p11, %p649_p12 }
  0x2e   : > { %p679_p2 = pneg %p678_p1 }
  0x30   : > { %p684_p6 = pnand %p682_p4, %p679_p2 }
  0x32   : > { %687 = shalt.err (!%p684_p6)
}
  0x33   : > { %s688_s25 = scalar_lea.vmem %s891_s28, 512  ;;  %p696_p3 = scmp.lt.s32.totalorder %s891_s28, %s891_s28 }
  0x34   : > { %p689_p8 = scmp.ne.s32.totalorder %s891_s28, %s688_s25  ;;  %p697_p5 = scmp.lt.s32.totalorder %s688_s25, %s688_s25 }
  0x36   : > { %p691_p13 = pnand %p689_p8, %p649_p12  ;;  %p698_p7 = por %p697_p5, %p696_p3 }
  0x38   : > { %p692_p0 = pneg %p691_p13 }
  0x3a   : > { %p699_p9 = pnand %p698_p7, %p692_p0 }
  0x3c   : > { %702 = shalt.err (!%p699_p9)
}
  0x3d   : > { %591 = dma.hbm_to_vmem [thread:$0]  (!%p887_p10), %s1071_s3, 512, %s891_s28, [#allocation6], %s807_s11, %s807_s11, %s808_s12  }
  0x3e   : > { %s941_s9 = sadd.s32 1, %s803_s18   ;;  %s28_s26 = sadd.s32 1, %s799_s17 }
  0x3f   : > { %s25_s10 = ssub.s32 %s803_s18, %s941_s9  ;;  %p35_p12 = scmp.ne.s32.totalorder %s799_s17, %s795_s16 }
  0x40   : > { %p26_p11 = scmp.eq.s32.totalorder %s25_s10, 0  ;;  %p36_p1 = scmp.eq.s32.totalorder %s803_s18, 0 }
  0x41   : > { %p1080_p2 = scmp.eq.s32.totalorder %s860_s19, 2  ;;  %p602_p6 = scmp.lt.s32.totalorder %s803_s18, 3 }
  0x42   : > { %s957_s14 = scalar_select %p26_p11, %s799_s17, %s28_s26  }
  0x43   : > { %p951_p4 = por %p1080_p2, %p35_p12  ;;  %p37_p8 = por %p36_p1, %p35_p12 }
  0x44   : > { %s183_s20 = sand.u32 1, %s799_s17   ;;  %s516_s28 = sshll.u32 %s803_s18, 7 }
  0x45   : > { %s515_s24 = sshll.u32 %s183_s20, 3  ;;  %s964_s27 = scalar_lea.hbm %s1068_s0, %s516_s28 }
  0x46   : > { %s187_s29 = scalar_lea.vmem [#allocation2], %s515_s24  ;;  %p968_p10 = pnand %p602_p6, %p37_p8 }
  0x47   : > { %s194_s30 = sshll.u32 %s187_s29, 4  ;;  %s184_s6 = scalar_lea.sflag [#allocation3], %s183_s20  ;;  %s966_s30 = int_to_ptr.vmem [resolvable:$true] %s194_s30 }
  0x48   : > { %s703_s25 = scalar_lea.hbm %s964_s27, 128  ;;  %p705_p0 = pneg %p968_p10 }
  0x49   : > { %p704_p13 = scmp.ne.s32.totalorder %s964_s27, %s703_s25  ;;  %s708_s26 = scalar_lea.hbm %s1068_s0, 384 }
  0x4a   : > { %p709_p7 = scmp.lt.u32.totalorder %s964_s27, %s1068_s0  ;;  %p710_p9 = scmp.lt.u32.totalorder %s708_s26, %s703_s25 }
  0x4b   : > { %p706_p3 = pnand %p705_p0, %p704_p13  ;;  %p712_p11 = scmp.lt.u32.totalorder %s703_s25, %s964_s27 }
  0x4c   : > { %p711_p12 = por %p710_p9, %p709_p7 }
  0x4d   : > { %p707_p5 = pneg %p706_p3 }
  0x4e   : > { %p713_p1 = por %p712_p11, %p711_p12 }
  0x50   : > { %p714_p2 = pnand %p713_p1, %p707_p5 }
  0x52   : > { %717 = shalt.err (!%p714_p2)
}
  0x53   : > { %s718_s20 = scalar_lea.vmem %s966_s30, 128  ;;  %s809_s28 = smov [#allocation2]  }
  0x54   : > { %p719_p6 = scmp.ne.s32.totalorder %s966_s30, %s718_s20  ;;  %s723_s11 = sshll.u32 %s809_s28, 4  ;;  %s724_s11 = int_to_ptr.vmem [resolvable:$false] %s723_s11 }
  0x55   : > { %s725_s12 = scalar_lea.vmem %s724_s11, 256  ;;  %p726_p3 = scmp.lt.s32.totalorder %s966_s30, %s724_s11 }
  0x56   : > { %p721_p8 = pnand %p719_p6, %p705_p0  ;;  %p727_p7 = scmp.lt.s32.totalorder %s725_s12, %s718_s20 }
  0x58   : > { %p722_p13 = pneg %p721_p8  ;;  %p728_p9 = por %p727_p7, %p726_p3 }
  0x5a   : > { %p729_p12 = pnand %p728_p9, %p722_p13 }
  0x5c   : > { %732 = shalt.err (!%p729_p12)
}
  0x5d   : > { %595 = dma.hbm_to_vmem [thread:$0]  (!%p968_p10), %s964_s27, 128, %s966_s30, %s184_s6  }
  0x5e   : > { %p1083_p5 = scmp.ne.s32.totalorder %s1078_s23, 0 }
  0x5f   : > { %s1000_s29 = sand.u32 (!%p1083_p5), 1, %s795_s16   ;;  %p1084_p0 = scmp.ne.s32.totalorder (!%p1083_p5), %s1076_s21, 0 }
  0x60   : > { %203 = sbr.rel (%p1083_p5) target bundleno = 568 (0x238), region = 36  ;;  %s518_s25 = sshll.u32 (!%p1083_p5), %s1000_s29, 3 }
  0x61   : > { %s206_s7 = scalar_lea.sflag (!%p1083_p5), [#allocation3], %s1000_s29  ;;  %s209_s8 = scalar_lea.vmem (!%p1083_p5), [#allocation2], %s518_s25 }
  0x67   : > { %778 = dma.done.wait (%p1084_p0), %s206_s7, 128  }
  0x68   : > { %780 = vsyncadd (%p1084_p0), %s206_s7, 4294967168  ;;  %p1085_p10 = scmp.eq.s32.totalorder %s860_s19, 0 }
  0x6a   : > { %782 = dma.done.wait (%p1085_p10), [#allocation6], 1024   ;;  %p1086_p11 = pmov %p1085_p10 }
  0x6b   : > { %v810_v0 = vmov 0.0|0.0   ;;  %vm811_vm0 = vmmov 0   ;;  %v812_v1 = vmov 0.0   ;;  %v243_v2 = vld [vmem:[#allocation5] sm:$0xff]  ;;  %v244_v3 = vld [vmem:[#allocation5 + $0x8] sm:$0xff]  ;;  %v245_v4 = vld [vmem:[#allocation5 + $0x10] sm:$0xff] }
  0x6c   : > { %784 = vsyncadd (%p1086_p11), [#allocation6], 4294966272  ;;  %561 = vmatprep.subr.bf16.mxu0 %v810_v0  ;;  %547 = vmatprep.mubr.msk.f32.mxu0 %vm811_vm0, %v812_v1  ;;  %v562_v5 = vpack.c.bf16 %v244_v3, %v243_v2  ;;  %v246_v6 = vld [vmem:[#allocation5 + $0x18] sm:$0xff]  ;;  %vm254_vm1 = vcmask 261120   ;;  %v329_v9 = vld [vmem:[#allocation7] sm:$0xff]  ;;  %s241_s27 = scalar_lea.vmem [#allocation8], %s518_s25 }
  0x6d   : > { %567 = vmatprep.subr.bf16.mxu1 %v810_v0  ;;  %558 = vmatprep.mubr.msk.f32.mxu1 %vm811_vm0, %v812_v1  ;;  %v565_v7 = vpack.c.bf16 %v246_v6, %v245_v4  ;;  %v242_v8 = vld [vmem:[%s209_s8] sm:$0xff]  ;;  %v330_v10 = vld [vmem:[#allocation7 + $0x8] sm:$0xff]  ;;  %s421_s30 = sshll.u32 %s241_s27, 4  ;;  %s526_s5 = sshll.u32 %s860_s19, 7  ;;  %s1022_s30 = int_to_ptr.vmem [resolvable:$true] %s421_s30 }
  0x6e   : > { %563 = vmatpush3.bf16.msra.mxu0 %v562_v5  ;;  %v331_v11 = vld [vmem:[#allocation7 + $0x10] sm:$0xff]  ;;  %v568_v12 = vpack.c.bf16 %v330_v10, %v329_v9  ;;  %v332_v13 = vld [vmem:[#allocation7 + $0x18] sm:$0xff]  ;;  %s1027_s10 = scalar_lea.hbm %s1072_s4, %s526_s5  ;;  %s408_s24 = scalar_lea.sflag [#allocation4], %s1000_s29 }
  0x6f   : > { %564 = vmatprep.subr.bf16.mxu0 %v810_v0  ;;  %v571_v14 = vpack.c.bf16 %v332_v13, %v331_v11  ;;  %v522_v15 = vld [vmem:[%s1070_s2] ss:$0 sm:$0xff]  ;;  %s733_s20 = scalar_lea.vmem %s1022_s30, 128  ;;  %s813_s19 = smov [#allocation8]  }
  0x70   : > { %569 = vmatpush3.bf16.msra.mxu1 %v568_v12  ;;  %p734_p1 = scmp.ne.s32.totalorder %s1022_s30, %s733_s20  ;;  %s737_s28 = sshll.u32 %s813_s19, 4  ;;  %s738_s28 = int_to_ptr.vmem [resolvable:$false] %s737_s28 }
  0x71   : > { %570 = vmatprep.subr.bf16.mxu1 %v810_v0  ;;  %s739_s11 = scalar_lea.vmem %s738_s28, 256  ;;  %p740_p8 = scmp.lt.s32.totalorder %s1022_s30, %s738_s28 }
  0x72   : > { %566 = vmatpush3.bf16.msra.mxu0 %v565_v7  ;;  %p735_p2 = pnand %p734_p1, %p951_p4  ;;  %p741_p13 = scmp.lt.s32.totalorder %s739_s11, %s733_s20 }
  0x74   : > { %572 = vmatpush3.bf16.msra.mxu1 %v571_v14  ;;  %p736_p6 = pneg %p735_p2  ;;  %p742_p3 = por %p741_p13, %p740_p8 }
  0x75   : > { %548 = vmatmul.mubr.msk.f32.vlgmr.msra.gmra.mrb[0].mxu0 %vm254_vm1, %v242_v8 }
  0x76   : > { %p743_p7 = pnand %p742_p3, %p736_p6 }
 0x148   : > { %v324_v16 = vpop.f32.mrb[0].mxu0 }
 0x149   : > { %v325_v17 = vadd.f32 %v522_v15, %v324_v16  ;;  %v549_v18 = vpop.f32.mrb[1].mxu0 }
 0x14b   : > { %645 = vtanh.f32 %v325_v17 }
 0x155   : > { %v646_v19 = vpop.eup %645 }
 0x156   : > { %559 = vmatmul.mubr.msk.f32.vlgmr.msra.gmra.mrb[0].mxu1 %vm254_vm1, %v646_v19 }
 0x229   : > { %v402_v20 = vpop.f32.mrb[0].mxu1 }
 0x22a   : > { %406 = vst [vmem:[%s241_s27] sm:$0xff] %v402_v20  ;;  %v560_v21 = vpop.f32.mrb[1].mxu1 }
 0x22b   : > { %746 = shalt.err (!%p743_p7)
}
 0x22c   : > { %s747_s12 = scalar_lea.hbm %s1027_s10, 128  ;;  %s751_s7 = scalar_lea.hbm %s1072_s4, 384 }
 0x22d   : > { %p748_p9 = scmp.ne.s32.totalorder %s1027_s10, %s747_s12  ;;  %p752_p0 = scmp.lt.u32.totalorder %s1027_s10, %s1072_s4 }
 0x22e   : > { %p753_p10 = scmp.lt.u32.totalorder %s751_s7, %s747_s12  ;;  %p755_p1 = scmp.lt.u32.totalorder %s747_s12, %s1027_s10 }
 0x22f   : > { %p749_p12 = pnand %p748_p9, %p951_p4 }
 0x230   : > { %p754_p11 = por %p753_p10, %p752_p0 }
 0x231   : > { %p750_p5 = pneg %p749_p12 }
 0x232   : > { %p756_p2 = por %p755_p1, %p754_p11 }
 0x234   : > { %p757_p6 = pnand %p756_p2, %p750_p5 }
 0x236   : > { %760 = shalt.err (!%p757_p6)
}
 0x237   : > { %583 = dma.vmem_to_hbm [thread:$0]  (%p951_p4), %s1022_s30, 128, %s1027_s10, %s408_s24  }
 0x238 PF: > { %p605_p8 = scmp.ge.s32.totalorder %s803_s18, 2  ;;  %s433_s23 = sand.u32 1, %s791_s15  }
 0x239   : > { %p1087_p13 = scmp.ne.s32.totalorder %s1077_s22, 0  ;;  %s434_s27 = scalar_lea.sflag [#allocation4], %s433_s23 }
 0x23b   : > { %p597_p3 = pnand %p605_p8, %p1087_p13 }
 0x23d   : > { %786 = dma.done.wait (!%p597_p3), %s434_s27, 128  }
 0x23e   : > { %788 = vsyncadd (!%p597_p3), %s434_s27, 4294967168  ;;  %p18_p7 = scmp.ge.s32.totalorder %s941_s9, 5   ;;  %s1088_s15 = smov %s795_s16 }
 0x23f   : > { %s1089_s16 = smov %s799_s17  ;;  %s1090_s17 = smov %s957_s14 }
 0x240   : > { %s1091_s18 = smov %s941_s9  ;;  %20 = sbr.rel (!%p18_p7) target bundleno = 6 (0x6), region = 89 }
 0x247   :  { %439 = vsyncpa [#allocation3], 1 }
 0x248   :  { %441 = vsyncpa [#allocation3 + $0x1], 1 }
 0x249   :  { %442 = vsyncpa [#allocation6], 1 }
 0x24a   :  { %443 = vsyncpa [#allocation4], 1 }
 0x24b   :  { %445 = vsyncpa [#allocation4 + $0x1], 1 }

</bundles_post_ra>
